<compile_context>
chip_gen: v6e
topology: v6e:2x2x1
jax: 0.10.0
libtpu: 0.0.40
codegen_flags: <defaults>
</compile_context>

<pallas_src>
import jax
import jax.numpy as jnp
from jax.experimental import pallas as pl
from jax.experimental.pallas import tpu as pltpu

HIDDEN1 = 128
HIDDEN2 = 256


def _round_up(n, m):
    return ((n + m - 1) // m) * m


def _cdiv(a, b):
    return (a + b - 1) // b


def mlp_kernel(x_ref, w1_ref, b1_ref, w2_ref, b2_ref, w3_ref, b3_ref, o_ref):
    # x arrives as raw f32 (no wrapper pad/cast pass); cast to bf16 in VMEM (VPU,
    # effectively free) so all three matmuls run on the MXU with f32 accumulation.
    x = x_ref[...].astype(jnp.bfloat16)
    # layer1
    h1 = jnp.dot(x, w1_ref[...], preferred_element_type=jnp.float32)
    h1 = jnp.maximum(h1 + b1_ref[...], 0.0).astype(jnp.bfloat16)   # bias/ReLU in f32
    # layer2
    h2 = jnp.dot(h1, w2_ref[...], preferred_element_type=jnp.float32)
    h2 = jnp.maximum(h2 + b2_ref[...], 0.0).astype(jnp.bfloat16)
    # layer3 (no activation)
    o = jnp.dot(h2, w3_ref[...], preferred_element_type=jnp.float32)
    o_ref[...] = (o + b3_ref[...]).astype(o_ref.dtype)


def net_forward(x, params, *, tile_b=512, vmem_budget_bytes=20 << 20):
    """x: (B, ...) — flattened from dim 1 like torch.flatten(start_dim=1)."""
    w1, b1, w2, b2, w3, b3 = params
    B = x.shape[0]
    in_features = w1.shape[0]
    out_features = w3.shape[1]

    # flatten(start_dim=1); pass raw f32 straight to the kernel (no pad/cast copy).
    xf = x.reshape(B, -1).astype(jnp.float32)
    assert xf.shape[1] == in_features

    # bf16 weights for the MXU; biases as (1, N) f32 rows.
    w1b = w1.astype(jnp.bfloat16)
    w2b = w2.astype(jnp.bfloat16)
    w3b = w3.astype(jnp.bfloat16)
    b1f = b1.reshape(1, HIDDEN1).astype(jnp.float32)
    b2f = b2.reshape(1, HIDDEN2).astype(jnp.float32)
    b3f = b3.reshape(1, out_features).astype(jnp.float32)

    # The pipeliner double-buffers every input (even constant-index-map ones);
    # account for that when budgeting the batch tile.
    weight_bytes = 2 * ((w1b.size + w2b.size + w3b.size) * 2
                        + (b1f.size + b2f.size + b3f.size) * 4)
    per_row_bytes = 4 * (in_features + out_features)        # f32 x tile + f32 out tile
    avail = max(vmem_budget_bytes - weight_bytes, 1 << 20)
    tb_cap = max(8, min(_round_up(tile_b, 8), (avail // (2 * per_row_bytes)) // 8 * 8))

    # >= 2 batch tiles whenever possible so the "parallel" axis can use both v7x TCs;
    # tb derived from cdiv(B, n_tiles) keeps tail padding <= 7 rows.
    n_tiles = _cdiv(B, tb_cap)
    if n_tiles < 2 and B >= 16:
        n_tiles = 2
    tb = max(8, _round_up(_cdiv(B, n_tiles), 8))
    n_tiles = _cdiv(B, tb)

    est_vmem = weight_bytes + 2 * tb * per_row_bytes + (2 << 20)
    vmem_limit = None
    if est_vmem > (12 << 20):      # beyond v5e's 16 MiB default scoped VMEM comfort zone
        vmem_limit = min(_round_up(est_vmem, 1 << 20), 64 << 20)

    # Weights/biases: constant block index -> fetched once, VMEM-resident across grid.
    resident = lambda shape: pl.BlockSpec(shape, lambda i: (0, 0))

    flops = 2 * B * (in_features * HIDDEN1 + HIDDEN1 * HIDDEN2 + HIDDEN2 * out_features)
    bytes_accessed = (xf.size * 4
                      + (w1b.size + w2b.size + w3b.size) * 2
                      + (b1f.size + b2f.size + b3f.size) * 4
                      + B * out_features * 4)

    # TODO(synk): for very large in_features (>~32K) add a K grid axis over
    # in_features with an f32 accumulator scratch so w1 streams in chunks instead of
    # being fully VMEM-resident (needed to respect v7x's 64 MiB VMEM).
    out = pl.pallas_call(
        mlp_kernel,
        out_shape=jax.ShapeDtypeStruct((B, out_features), jnp.float32),
        grid=(n_tiles,),
        in_specs=[
            pl.BlockSpec((tb, in_features), lambda i: (i, 0)),   # x: batch-tiled
            resident(w1b.shape), resident(b1f.shape),
            resident(w2b.shape), resident(b2f.shape),
            resident(w3b.shape), resident(b3f.shape),
        ],
        out_specs=pl.BlockSpec((tb, out_features), lambda i: (i, 0)),
        compiler_params=pltpu.CompilerParams(
            dimension_semantics=("parallel",),
            vmem_limit_bytes=vmem_limit),
        cost_estimate=pl.CostEstimate(
            flops=flops, transcendentals=0, bytes_accessed=bytes_accessed),
    )(xf, w1b, b1f, w2b, b2f, w3b, b3f)

    return out


def init_params(key, in_features, out_features):
    """Deterministic init mimicking nn.Linear default (uniform ±1/sqrt(fan_in)).
    Weights stored as (in, out) — transposed vs torch's (out, in) — so the hot
    path is y = x @ W + b on the MXU; biases stored as (1, H) rows."""
    ks = jax.random.split(key, 6)

    def linear(kw, kb, fan_in, fan_out):
        bound = 1.0 / jnp.sqrt(fan_in)
        w = jax.random.uniform(kw, (fan_in, fan_out), jnp.float32, -bound, bound)
        b = jax.random.uniform(kb, (1, fan_out), jnp.float32, -bound, bound)
        return w, b

    w1, b1 = linear(ks[0], ks[1], in_features, HIDDEN1)
    w2, b2 = linear(ks[2], ks[3], HIDDEN1, HIDDEN2)
    w3, b3 = linear(ks[4], ks[5], HIDDEN2, out_features)
    return (w1, b1, w2, b2, w3, b3)


def net_reference(x, params, *, match_bf16=True):
    """Pure-JAX reference. With match_bf16=True it mirrors the kernel's bf16
    matmul inputs / f32 accumulation for tight numeric comparison."""
    w1, b1, w2, b2, w3, b3 = params
    xf = x.reshape(x.shape[0], -1).astype(jnp.float32)
    cast = (lambda a: a.astype(jnp.bfloat16)) if match_bf16 else (lambda a: a)
    h1 = jnp.maximum(
        jnp.dot(cast(xf), cast(w1), preferred_element_type=jnp.float32) + b1, 0.0)
    h2 = jnp.maximum(
        jnp.dot(cast(h1), cast(w2), preferred_element_type=jnp.float32) + b2, 0.0)
    return jnp.dot(cast(h2), cast(w3), preferred_element_type=jnp.float32) + b3


if __name__ == "__main__":
    key = jax.random.PRNGKey(0)
    k_x, k_p = jax.random.split(key)

    # Small shapes: batch=16, input (16, 4, 4, 4) -> flattened in_features = 64.
    # batch=16 exercises the >=2-tile path (2 tiles of 8 rows -> both v7x TCs).
    batch, c, h, w = 16, 4, 4, 4
    in_features = c * h * w
    out_features = 16

    x = jax.random.normal(k_x, (batch, c, h, w), dtype=jnp.float32)
    params = init_params(k_p, in_features, out_features)

    out = net_forward(x, params)
    out = jax.block_until_ready(out)
    assert out.shape == (batch, out_features)

    # Tight check vs bf16-matched reference, loose check vs pure-f32 semantics.
    ref_bf16 = net_reference(x, params, match_bf16=True)
    ref_f32 = net_reference(x, params, match_bf16=False)
    assert jnp.allclose(out, ref_bf16, atol=2e-3, rtol=2e-3), "mismatch vs bf16 reference"
    assert jnp.allclose(out, ref_f32, atol=3e-2, rtol=3e-2), "mismatch vs f32 reference"

    print("KERNEL_OK")
</pallas_src>

<mosaic_0001>
module attributes {stable_mosaic.version = 11 : i64} {
  func.func @mlp_kernel(%arg0: i32, %arg1: memref<8x64xf32, #tpu.memory_space<vmem>>, %arg2: memref<64x128xbf16, #tpu.memory_space<vmem>>, %arg3: memref<1x128xf32, #tpu.memory_space<vmem>>, %arg4: memref<128x256xbf16, #tpu.memory_space<vmem>>, %arg5: memref<1x256xf32, #tpu.memory_space<vmem>>, %arg6: memref<256x16xbf16, #tpu.memory_space<vmem>>, %arg7: memref<1x16xf32, #tpu.memory_space<vmem>>, %arg8: memref<8x16xf32, #tpu.memory_space<vmem>>) attributes {dimension_semantics = [#tpu.dimension_semantics<parallel>], iteration_bounds = array<i64: 2>, scalar_prefetch = 0 : i64, scratch_operands = 0 : i64, tpu.core_type = #tpu.core_type<tc>, window_params = [{transform_indices = @transform_0, window_bounds = array<i64: 8, 64>}, {pipeline_mode = #tpu.pipeline_mode<synchronous>, transform_indices = @transform_1, window_bounds = array<i64: 64, 128>}, {pipeline_mode = #tpu.pipeline_mode<synchronous>, transform_indices = @transform_2, window_bounds = array<i64: 1, 128>}, {pipeline_mode = #tpu.pipeline_mode<synchronous>, transform_indices = @transform_3, window_bounds = array<i64: 128, 256>}, {pipeline_mode = #tpu.pipeline_mode<synchronous>, transform_indices = @transform_4, window_bounds = array<i64: 1, 256>}, {pipeline_mode = #tpu.pipeline_mode<synchronous>, transform_indices = @transform_5, window_bounds = array<i64: 256, 16>}, {pipeline_mode = #tpu.pipeline_mode<synchronous>, transform_indices = @transform_6, window_bounds = array<i64: 1, 16>}, {transform_indices = @transform_7, window_bounds = array<i64: 8, 16>}]} {
    %c0 = arith.constant 0 : index
    %c0_0 = arith.constant 0 : index
    %0 = vector.load %arg1[%c0, %c0_0] : memref<8x64xf32, #tpu.memory_space<vmem>>, vector<8x64xf32>
    %1 = arith.truncf %0 : vector<8x64xf32> to vector<8x64xbf16>
    %c0_1 = arith.constant 0 : index
    %c0_2 = arith.constant 0 : index
    %2 = vector.load %arg2[%c0_1, %c0_2] : memref<64x128xbf16, #tpu.memory_space<vmem>>, vector<64x128xbf16>
    %cst = arith.constant dense<0.000000e+00> : vector<8x128xf32>
    %3 = tpu.matmul %1, %2, %cst {dimension_numbers = #tpu.dot_dimension_numbers<[1], [0], [0], [1], [0, 0, 1, 1], [], []>} : vector<8x64xbf16>, vector<64x128xbf16>, vector<8x128xf32> -> vector<8x128xf32>
    %c0_3 = arith.constant 0 : index
    %c0_4 = arith.constant 0 : index
    %4 = vector.load %arg3[%c0_3, %c0_4] : memref<1x128xf32, #tpu.memory_space<vmem>>, vector<1x128xf32>
    %5 = vector.broadcast %4 : vector<1x128xf32> to vector<8x128xf32>
    %6 = arith.addf %3, %5 : vector<8x128xf32>
    %cst_5 = arith.constant 0.000000e+00 : f32
    %7 = vector.broadcast %cst_5 : f32 to vector<8x128xf32>
    %8 = arith.maximumf %6, %7 : vector<8x128xf32>
    %9 = arith.truncf %8 : vector<8x128xf32> to vector<8x128xbf16>
    %c0_6 = arith.constant 0 : index
    %c0_7 = arith.constant 0 : index
    %10 = vector.load %arg4[%c0_6, %c0_7] : memref<128x256xbf16, #tpu.memory_space<vmem>>, vector<128x256xbf16>
    %cst_8 = arith.constant dense<0.000000e+00> : vector<8x256xf32>
    %11 = tpu.matmul %9, %10, %cst_8 {dimension_numbers = #tpu.dot_dimension_numbers<[1], [0], [0], [1], [0, 0, 1, 1], [], []>} : vector<8x128xbf16>, vector<128x256xbf16>, vector<8x256xf32> -> vector<8x256xf32>
    %c0_9 = arith.constant 0 : index
    %c0_10 = arith.constant 0 : index
    %12 = vector.load %arg5[%c0_9, %c0_10] : memref<1x256xf32, #tpu.memory_space<vmem>>, vector<1x256xf32>
    %13 = vector.broadcast %12 : vector<1x256xf32> to vector<8x256xf32>
    %14 = arith.addf %11, %13 : vector<8x256xf32>
    %cst_11 = arith.constant 0.000000e+00 : f32
    %15 = vector.broadcast %cst_11 : f32 to vector<8x256xf32>
    %16 = arith.maximumf %14, %15 : vector<8x256xf32>
    %17 = arith.truncf %16 : vector<8x256xf32> to vector<8x256xbf16>
    %c0_12 = arith.constant 0 : index
    %c0_13 = arith.constant 0 : index
    %18 = vector.load %arg6[%c0_12, %c0_13] : memref<256x16xbf16, #tpu.memory_space<vmem>>, vector<256x16xbf16>
    %cst_14 = arith.constant dense<0.000000e+00> : vector<8x16xf32>
    %19 = tpu.matmul %17, %18, %cst_14 {dimension_numbers = #tpu.dot_dimension_numbers<[1], [0], [0], [1], [0, 0, 1, 1], [], []>} : vector<8x256xbf16>, vector<256x16xbf16>, vector<8x16xf32> -> vector<8x16xf32>
    %c0_15 = arith.constant 0 : index
    %c0_16 = arith.constant 0 : index
    %20 = vector.load %arg7[%c0_15, %c0_16] : memref<1x16xf32, #tpu.memory_space<vmem>>, vector<1x16xf32>
    %21 = vector.broadcast %20 : vector<1x16xf32> to vector<8x16xf32>
    %22 = arith.addf %19, %21 : vector<8x16xf32>
    %c0_17 = arith.constant 0 : index
    %c0_18 = arith.constant 0 : index
    %23 = vector.load %arg8[%c0_17, %c0_18] : memref<8x16xf32, #tpu.memory_space<vmem>>, vector<8x16xf32>
    tpu.vector_store %arg8[%c0_17, %c0_18], %22 {strides = array<i32>} : memref<8x16xf32, #tpu.memory_space<vmem>>, vector<8x16xf32>,
    return
  }
  func.func @transform_0(%arg0: i32) -> (i32, i32) {
    %c0_i32 = arith.constant 0 : i32
    %c0_i32_0 = arith.constant 0 : i32
    return %arg0, %c0_i32 : i32, i32
  }
  func.func @transform_1(%arg0: i32) -> (i32, i32) {
    %c0_i32 = arith.constant 0 : i32
    %c0_i32_0 = arith.constant 0 : i32
    %c0_i32_1 = arith.constant 0 : i32
    return %c0_i32, %c0_i32_0 : i32, i32
  }
  func.func @transform_2(%arg0: i32) -> (i32, i32) {
    %c0_i32 = arith.constant 0 : i32
    %c0_i32_0 = arith.constant 0 : i32
    %c0_i32_1 = arith.constant 0 : i32
    return %c0_i32, %c0_i32_0 : i32, i32
  }
  func.func @transform_3(%arg0: i32) -> (i32, i32) {
    %c0_i32 = arith.constant 0 : i32
    %c0_i32_0 = arith.constant 0 : i32
    %c0_i32_1 = arith.constant 0 : i32
    return %c0_i32, %c0_i32_0 : i32, i32
  }
  func.func @transform_4(%arg0: i32) -> (i32, i32) {
    %c0_i32 = arith.constant 0 : i32
    %c0_i32_0 = arith.constant 0 : i32
    %c0_i32_1 = arith.constant 0 : i32
    return %c0_i32, %c0_i32_0 : i32, i32
  }
  func.func @transform_5(%arg0: i32) -> (i32, i32) {
    %c0_i32 = arith.constant 0 : i32
    %c0_i32_0 = arith.constant 0 : i32
    %c0_i32_1 = arith.constant 0 : i32
    return %c0_i32, %c0_i32_0 : i32, i32
  }
  func.func @transform_6(%arg0: i32) -> (i32, i32) {
    %c0_i32 = arith.constant 0 : i32
    %c0_i32_0 = arith.constant 0 : i32
    %c0_i32_1 = arith.constant 0 : i32
    return %c0_i32, %c0_i32_0 : i32, i32
  }
  func.func @transform_7(%arg0: i32) -> (i32, i32) {
    %c0_i32 = arith.constant 0 : i32
    %c0_i32_0 = arith.constant 0 : i32
    return %arg0, %c0_i32 : i32, i32
  }
}

</mosaic_0001>

<bundles_post_ra>
// kernel: tpu_custom_call.1
= control target key start
LH: loop header
LB: loop body
LE: loop exit
PB: predicated region body
PF: predicated region fallthrough
CT: control target
= control target key end

     0   :  { %12 = vsyncpa [#allocation3], 0  ;;  %s1336_s0 = inlined_call_operand.vmem [shape: f32[16,64], index: 0, kind: input, shape index: {}]   ;;  %s1337_s1 = inlined_call_operand.hbm [shape: bf16[64,128], index: 1, kind: input, shape index: {}]   ;;  %s1338_s2 = inlined_call_operand.vmem [shape: f32[1,128], index: 2, kind: input, shape index: {}]   ;;  %s1339_s3 = inlined_call_operand.vmem [shape: bf16[128,256], index: 3, kind: input, shape index: {}]   ;;  %s1340_s4 = inlined_call_operand.vmem [shape: f32[1,256], index: 4, kind: input, shape index: {}]   ;;  %s1341_s5 = inlined_call_operand.vmem [shape: bf16[256,16], index: 5, kind: input, shape index: {}]   ;;  %s1342_s6 = inlined_call_operand.vmem [shape: f32[1,16], index: 6, kind: input, shape index: {}]   ;;  %s1343_s7 = inlined_call_operand.hbm [shape: f32[16,16], index: 7, kind: output, shape index: {}]  }
   0x1   :  { %13 = vsyncpa [#allocation4], 0 }
   0x2   :  { %15 = vsyncpa [#allocation4 + $0x1], 0  ;;  %s1120_s24 = smov 0   ;;  %s1122_s25 = smov 0  }
   0x3   :  { %s1124_s26 = smov 0   ;;  %s1126_s27 = smov 0  }
   0x4 LB: > { %s1141_s28 = sadd.s32 4294967295, %s1071_s27   ;;  %s792_s29 = sadd.s32 4294967294, %s1071_s27   ;;  %s1071_s27 = sphi %s1126_s27, %s1351_s27   ;;  %s1067_s26 = sphi %s1124_s26, %s1350_s26   ;;  %s1063_s25 = sphi %s1122_s25, %s1349_s25   ;;  %s1059_s24 = sphi %s1120_s24, %s1348_s24  }
   0x5   : > { %s1145_s30 = sadd.s32 1, %s1071_s27   ;;  %s180_s8 = sadd.s32 1, %s1067_s26 }
   0x6   : > { %s177_s9 = ssub.s32 %s1071_s27, %s1145_s30  ;;  %p190_p0 = scmp.ne.s32.totalorder %s1067_s26, %s1063_s25 }
   0x7   : > { %p178_p1 = scmp.eq.s32.totalorder %s177_s9, 0  ;;  %p191_p2 = scmp.eq.s32.totalorder %s1141_s28, 1 }
   0x8   : > { %p196_p3 = scmp.ne.s32.totalorder %s1063_s25, %s1059_s24  ;;  %p197_p4 = scmp.eq.s32.totalorder %s792_s29, 1 }
   0x9   : > { %s1156_s10 = scalar_select %p178_p1, %s1067_s26, %s180_s8  }
   0xa   : > { %p1158_p5 = por %p191_p2, %p190_p0  ;;  %p1162_p6 = por %p197_p4, %p196_p3 }
   0xb   : > { %p793_p7 = scmp.ge.s32.totalorder %s1071_s27, 1  ;;  %p204_p8 = scmp.lt.s32.totalorder %s1071_s27, 3 }
   0xc   : > { %s1345_s12 = scalar_select %p1162_p6, 1, 0 }
   0xd   : > { %p896_p9 = scmp.eq.s32.totalorder %s1141_s28, 0  ;;  %p1169_p10 = pnand %p793_p7, %p204_p8 }
   0xe   : > { %s1073_s14 = smov [#allocation2]  }
   0xf   : > { %s216_s15 = sshll.u32 %s1073_s14, 4  ;;  %p888_p11 = pneg %p1169_p10  ;;  %s217_s15 = int_to_ptr.vmem [resolvable:$true] %s216_s15 }
  0x10   : > { %s992_s16 = scalar_lea.vmem %s217_s15, 512  ;;  %p1000_p3 = scmp.lt.s32.totalorder %s217_s15, %s217_s15 }
  0x11   : > { %p889_p12 = pnand %p896_p9, %p888_p11  ;;  %p993_p0 = scmp.ne.s32.totalorder %s217_s15, %s992_s16 }
  0x12   : > { %p1001_p4 = scmp.lt.s32.totalorder %s992_s16, %s992_s16 }
  0x13   : > { %p983_p13 = pneg %p889_p12 }
  0x14   : > { %p1002_p6 = por %p1001_p4, %p1000_p3 }
  0x15   : > { %p995_p1 = pnand %p993_p0, %p983_p13 }
  0x17   : > { %p996_p2 = pneg %p995_p1 }
  0x19   : > { %p1003_p7 = pnand %p1002_p6, %p996_p2 }
  0x1b   : > { %1006 = shalt.err (!%p1003_p7)
}
  0x1c   : > { %s1074_s17 = smov 64   ;;  %s1075_s18 = smov 4  }
  0x1d   : > { %891 = dma.hbm_to_vmem [thread:$0]  (!%p889_p12), %s1337_s1, 512, %s217_s15, [#allocation3], %s1074_s17, %s1074_s17, %s1075_s18  }
  0x1e   : > { %254 = sbr.rel (%p1169_p10) target bundleno = 666 (0x29a), region = 48 }
  0x23   : > { %1050 = dma.done.wait (%p896_p9), [#allocation3], 512  }
  0x24   : > { %1052 = vsyncadd (%p896_p9), [#allocation3], 4294966784  ;;  %v1076_v0 = vmov 0.0   ;;  %vm1077_vm0 = vmmov 0   ;;  %p285_p6 = scmp.lt.s32.totalorder %s1141_s28, 1  ;;  %v937_v1 = vld [vmem:[#allocation2 + $0x18] sm:$0xff]   ;;  %v395_v48 = vlaneseq }
  0x25   : > { %870 = vmatprep.subr.bf16.mxu0 %v1076_v0  ;;  %878 = vmatprep.mubr.msk.bf16.mxu0 %vm1077_vm0, %v1076_v0  ;;  %v938_v2 = vld [vmem:[#allocation2 + $0x10] sm:$0xff]   ;;  %v939_v5 = vld [vmem:[#allocation2 + $0x8] sm:$0xff]   ;;  %v940_v9 = vld [vmem:[#allocation2] sm:$0xff]   ;;  %vm331_vm1 = vcmask 523264   ;;  %v1078_v23 = vmov 0   ;;  %s840_s14 = sshll.u32 %s1141_s28, 7 }
  0x26   : > { %s286_s21 = scalar_select %p285_p6, %s1141_s28, 1  ;;  %871 = vmatpush3.bf16.msra.mxu0 %v937_v1  ;;  %v941_v3 = vld [vmem:[%s1339_s3 + $0x74] ss:$8 sps:$4 sm:$0xff]   ;;  %v943_v4 = vld [vmem:[%s1339_s3 + $0x70] ss:$8 sps:$4 sm:$0xff]   ;;  %517 = vmatprep.mubr.bf16.mxu1 %v1078_v23  ;;  %v969_v28 = vld [vmem:[%s1341_s5 + $0x68] sm:$0xff]  }
  0x27   : > { %872 = vmatprep.subr.bf16.mxu0 %v1076_v0  ;;  %v944_v6 = vld [vmem:[%s1339_s3 + $0x64] ss:$8 sps:$4 sm:$0xff]   ;;  %485 = vmatprep.subr.bf16.mxu1 %v941_v3  ;;  %v946_v7 = vld [vmem:[%s1339_s3 + $0x60] ss:$8 sps:$4 sm:$0xff]   ;;  %v947_v8 = vld [vmem:[%s1339_s3 + $0x54] ss:$8 sps:$4 sm:$0xff]   ;;  %s1301_s19 = scalar_lea.hbm %s1343_s7, %s840_s14 }
  0x28   : > { %s799_s22 = sshll.u32 %s286_s21, 3  ;;  %486 = vmatpush1.bf16.msra.mxu1 %v943_v4  ;;  %v949_v11 = vld [vmem:[%s1339_s3 + $0x50] ss:$8 sps:$4 sm:$0xff]   ;;  %v950_v13 = vld [vmem:[%s1339_s3 + $0x44] ss:$8 sps:$4 sm:$0xff]   ;;  %v396_v49 = vshrl.u32 %v395_v48, 7 }
  0x29   : > { %s288_s17 = scalar_lea.vmem %s1336_s0, %s799_s22  ;;  %487 = vmatprep.subr.bf16.mxu1 %v944_v6  ;;  %v952_v14 = vld [vmem:[%s1339_s3 + $0x40] ss:$8 sps:$4 sm:$0xff]   ;;  %v953_v15 = vld [vmem:[%s1339_s3 + $0x34] ss:$8 sps:$4 sm:$0xff]   ;;  %v955_v16 = vld [vmem:[%s1339_s3 + $0x30] ss:$8 sps:$4 sm:$0xff]  }
  0x2a   : > { %873 = vmatpush3.bf16.msra.mxu0 %v938_v2  ;;  %v290_v10 = vld [vmem:[%s288_s17] sm:$0xff]  ;;  %v959_v19 = vld [vmem:[%s1339_s3 + $0x14] ss:$8 sps:$4 sm:$0xff]   ;;  %v961_v20 = vld [vmem:[%s1339_s3 + $0x10] ss:$8 sps:$4 sm:$0xff]   ;;  %v397_v50 = vsub.s32 0, %v396_v49 }
  0x2b   : > { %874 = vmatprep.subr.bf16.mxu0 %v1076_v0  ;;  %v291_v12 = vpack.c.bf16 %v290_v10, %v290_v10  ;;  %v956_v17 = vld [vmem:[%s1339_s3 + $0x24] ss:$8 sps:$4 sm:$0xff]   ;;  %v958_v18 = vld [vmem:[%s1339_s3 + $0x20] ss:$8 sps:$4 sm:$0xff]   ;;  %v965_v24 = vld [vmem:[%s1341_s5 + $0x78] sm:$0xff]   ;;  %v401_v52 = vsub.s32 1, %v396_v49 }
  0x2c   : > { %488 = vmatpush1.bf16.msra.mxu1 %v946_v7  ;;  %v962_v21 = vld [vmem:[%s1339_s3 + $0x4] ss:$8 sps:$4 sm:$0xff]   ;;  %v964_v22 = vld [vmem:[%s1339_s3] ss:$8 sps:$4 sm:$0xff]   ;;  %v966_v25 = vld [vmem:[%s1341_s5 + $0x38] sm:$0xff]   ;;  %s282_s22 = sand.u32 1, %s1063_s25  }
  0x2d   : > { %489 = vmatprep.subr.bf16.mxu1 %v947_v8  ;;  %v967_v26 = vld [vmem:[%s1341_s5 + $0x70] sm:$0xff]   ;;  %v970_v29 = vld [vmem:[%s1341_s5 + $0x28] sm:$0xff]   ;;  %v971_v30 = vld [vmem:[%s1341_s5 + $0x60] sm:$0xff]   ;;  %s798_s8 = sshll.u32 %s282_s22, 3  ;;  %vm705_vm2 = vcmask 130048   ;;  %s708_s20 = scalar_lea.sflag [#allocation4], %s282_s22 }
  0x2e   : > { %875 = vmatpush3.bf16.msra.mxu0 %v939_v5  ;;  %v968_v27 = vld [vmem:[%s1341_s5 + $0x30] sm:$0xff]   ;;  %v972_v31 = vld [vmem:[%s1341_s5 + $0x20] sm:$0xff]   ;;  %v973_v32 = vld [vmem:[%s1341_s5 + $0x58] sm:$0xff]   ;;  %s284_s15 = scalar_lea.vmem [#allocation5], %s798_s8  ;;  %s1079_s28 = smov [#allocation5]  }
  0x2f   : > { %876 = vmatprep.subr.bf16.mxu0 %v1076_v0  ;;  %v974_v33 = vld [vmem:[%s1341_s5 + $0x18] sm:$0xff]   ;;  %v975_v34 = vld [vmem:[%s1341_s5 + $0x50] sm:$0xff]   ;;  %v800_v36 = vld [vmem:[%s1338_s2] ss:$0 sm:$0xff]  ;;  %s721_s16 = sshll.u32 %s284_s15, 4  ;;  %s1011_s23 = sshll.u32 %s1079_s28, 4  ;;  %s722_s16 = int_to_ptr.vmem [resolvable:$true] %s721_s16  ;;  %s1012_s23 = int_to_ptr.vmem [resolvable:$false] %s1011_s23 }
  0x30   : > { %490 = vmatpush1.bf16.msra.mxu1 %v949_v11  ;;  %v976_v35 = vld [vmem:[%s1341_s5 + $0x10] sm:$0xff]   ;;  %v977_v44 = vld [vmem:[%s1341_s5 + $0x48] sm:$0xff]   ;;  %v979_v46 = vld [vmem:[%s1341_s5 + $0x40] sm:$0xff]   ;;  %s1007_s21 = scalar_lea.vmem %s722_s16, 128  ;;  %s1013_s29 = scalar_lea.vmem %s1012_s23, 256 }
  0x31   : > { %491 = vmatprep.subr.bf16.mxu1 %v950_v13  ;;  %v978_v45 = vld [vmem:[%s1341_s5 + $0x8] sm:$0xff]   ;;  %v980_v47 = vld [vmem:[%s1341_s5] sm:$0xff]   ;;  %p1008_p8 = scmp.ne.s32.totalorder %s722_s16, %s1007_s21  ;;  %p1014_p11 = scmp.lt.s32.totalorder %s722_s16, %s1012_s23 }
  0x32   : > { %877 = vmatpush3.bf16.msra.mxu0 %v940_v9  ;;  %v393_v51 = vld [vmem:[%s1340_s4] sm:$0x3]  ;;  %p1015_p12 = scmp.lt.s32.totalorder %s1013_s29, %s1007_s21 }
  0x33   : > { %848 = vmatprep.subr.bf16.mxu0 %v965_v24  ;;  %v398_v53 = vrot.slane %v393_v51, %v397_v50  ;;  %v402_v54 = vrot.slane %v393_v51, %v401_v52  ;;  %v822_v2 = vld [vmem:[%s1342_s6] ss:$0 sm:$0xff]  ;;  %p1009_p9 = pnand %p1008_p8, %p1158_p5 }
  0x34   : > { %492 = vmatpush1.bf16.msra.mxu1 %v952_v14  ;;  %p1016_p13 = por %p1015_p12, %p1014_p11 }
  0x35   : > { %879 = vmatmul.mubr.msk.bf16.vlgmr.msra.gmra.mxu0 %vm331_vm1, %v291_v12  ;;  %493 = vmatprep.subr.bf16.mxu1 %v953_v15  ;;  %p1010_p10 = pneg %p1009_p9 }
  0x36   : > { %849 = vmatpush3.bf16.msra.mxu0 %v966_v25 }
  0x37   : > { %850 = vmatprep.subr.bf16.mxu0 %v967_v26  ;;  %p1017_p0 = pnand %p1016_p13, %p1010_p10 }
  0x38   : > { %494 = vmatpush1.bf16.msra.mxu1 %v955_v16 }
  0x39   : > { %495 = vmatprep.subr.bf16.mxu1 %v956_v17 }
  0x3a   : > { %851 = vmatpush3.bf16.msra.mxu0 %v968_v27 }
  0x3b   : > { %852 = vmatprep.subr.bf16.mxu0 %v969_v28 }
  0x3c   : > { %496 = vmatpush1.bf16.msra.mxu1 %v958_v18 }
  0x3d   : > { %497 = vmatprep.subr.bf16.mxu1 %v959_v19 }
  0x3e   : > { %853 = vmatpush3.bf16.msra.mxu0 %v970_v29 }
  0x3f   : > { %854 = vmatprep.subr.bf16.mxu0 %v971_v30 }
  0x40   : > { %498 = vmatpush1.bf16.msra.mxu1 %v961_v20 }
  0x41   : > { %499 = vmatprep.subr.bf16.mxu1 %v962_v21 }
  0x42   : > { %855 = vmatpush3.bf16.msra.mxu0 %v972_v31 }
  0x43   : > { %856 = vmatprep.subr.bf16.mxu0 %v973_v32 }
  0x44   : > { %500 = vmatpush1.bf16.msra.mxu1 %v964_v22 }
  0x46   : > { %857 = vmatpush3.bf16.msra.mxu0 %v974_v33 }
  0x47   : > { %858 = vmatprep.subr.bf16.mxu0 %v975_v34 }
  0x4a   : > { %859 = vmatpush3.bf16.msra.mxu0 %v976_v35 }
  0x4b   : > { %860 = vmatprep.subr.bf16.mxu0 %v977_v44 }
  0x4e   : > { %861 = vmatpush3.bf16.msra.mxu0 %v978_v45 }
  0x4f   : > { %862 = vmatprep.subr.bf16.mxu0 %v979_v46 }
  0x52   : > { %863 = vmatpush3.bf16.msra.mxu0 %v980_v47 }
  0xf5   : > { %v369_v37 = vpop.f32.mrf.mxu0 }
  0xf6   : > { %v370_v38 = vadd.f32 %v800_v36, %v369_v37 }
  0xf7   : > { %v880_v39 = vpop.f32.mrf.mxu0 }
  0xf8   : > { %v375_v40 = vmax.f32 %v370_v38, 0.0 }
  0xf9   : > { %v372_v41 = vpop.f32.mrf.mxu0 }
  0xfa   : > { %v376_v42 = vpack.c.bf16 %v375_v40, %v375_v40 }
  0xfb   : > { %v881_v43 = vpop.f32.mrf.mxu0 }
  0xfc   : > { %518 = vmatmul.mubr.bf16.vlgmr.msra.gmra.mxu1 %v376_v42 }
 0x1bc   : > { %v519_v55 = vpop.f32.mrf.mxu1 }
 0x1bd   : > { %v520_v56 = vadd.f32 %v519_v55, %v398_v53 }
 0x1be   : > { %v521_v57 = vpop.f32.mrf.mxu1 }
 0x1bf   : > { %v522_v58 = vadd.f32 %v521_v57, %v402_v54  ;;  %v526_v59 = vmax.f32 %v520_v56, 0.0 }
 0x1c0   : > { %v523_v60 = vpop.f32.mrf.mxu1 }
 0x1c1   : > { %v527_v61 = vmax.f32 %v522_v58, 0.0  ;;  %v528_v0 = vpack.c.bf16 %v526_v59, %v526_v59 }
 0x1c2   : > { %v524_v62 = vpop.f32.mrf.mxu1 }
 0x1c3   : > { %v529_v63 = vpack.c.bf16 %v527_v61, %v527_v61 }
 0x1c5   : > { %697 = vmatprep.mubr.bf16.mxu0 %v529_v63 }
 0x1c6   : > { %698 = vmatmul.mubr.bf16.vlgmr.msra.gmra.mxu0 %v528_v0 }
 0x286   : > { %v864_v1 = vpop.f32.mrf.mxu0 }
 0x288   : > { %v865_v3 = vpop.f32.mrf.mxu0 }
 0x289   : > { %v866_v4 = vadd.f32 %v865_v3, %v864_v1 }
 0x28a   : > { %v867_v5 = vpop.f32.mrf.mxu0 }
 0x28b   : > { %v700_v6 = vadd.f32 %v866_v4, %v822_v2 }
 0x28c   : > { %v868_v7 = vpop.f32.mrf.mxu0 }
 0x28d   : > { %706 = vst.msk [vmem:[%s284_s15] sm:$0xff] %vm705_vm2, %v700_v6 }
 0x28e   : > { %1020 = shalt.err (!%p1017_p0)
}
 0x28f   : > { %s1021_s8 = scalar_lea.hbm %s1301_s19, 128  ;;  %s1025_s13 = scalar_lea.hbm %s1343_s7, 256 }
 0x290   : > { %p1022_p1 = scmp.ne.s32.totalorder %s1301_s19, %s1021_s8  ;;  %p1026_p4 = scmp.lt.s32.totalorder %s1301_s19, %s1343_s7 }
 0x291   : > { %p1027_p7 = scmp.lt.s32.totalorder %s1025_s13, %s1021_s8 }
 0x292   : > { %p1023_p2 = pnand %p1022_p1, %p1158_p5 }
 0x293   : > { %p1028_p6 = por %p1027_p7, %p1026_p4 }
 0x294   : > { %p1024_p3 = pneg %p1023_p2 }
 0x296   : > { %p1029_p8 = pnand %p1028_p6, %p1024_p3 }
 0x298   : > { %1032 = shalt.err (!%p1029_p8)
}
 0x299   : > { %886 = dma.vmem_to_hbm [thread:$0]  (%p1158_p5), %s722_s16, 128, %s1301_s19, %s708_s20  }
 0x29a PF: > { %p898_p9 = scmp.ge.s32.totalorder %s1071_s27, 2  ;;  %s733_s17 = sand.u32 1, %s1059_s24  }
 0x29b   : > { %p1347_p10 = scmp.ne.s32.totalorder %s1345_s12, 0  ;;  %s734_s18 = scalar_lea.sflag [#allocation4], %s733_s17 }
 0x29d   : > { %p893_p11 = pnand %p898_p9, %p1347_p10 }
 0x29f   : > { %p894_p12 = pneg %p893_p11 }
 0x2a1   : > { %1054 = dma.done.wait (%p894_p12), %s734_s18, 128  }
 0x2a2   : > { %1056 = vsyncadd (%p894_p12), %s734_s18, 4294967168  ;;  %p18_p13 = scmp.ge.s32.totalorder %s1145_s30, 4   ;;  %s1348_s24 = smov %s1063_s25 }
 0x2a3   : > { %s1349_s25 = smov %s1067_s26  ;;  %s1350_s26 = smov %s1156_s10 }
 0x2a4   : > { %s1351_s27 = smov %s1145_s30  ;;  %20 = sbr.rel (!%p18_p13) target bundleno = 4 (0x4), region = 88 }
 0x2a9   :  { %739 = vsyncpa [#allocation3], 1 }
 0x2aa   :  { %741 = vsyncpa [#allocation3 + $0x1], 1 }
 0x2ab   :  { %742 = vsyncpa [#allocation4], 1 }
 0x2ac   :  { %744 = vsyncpa [#allocation4 + $0x1], 1 }

</bundles_post_ra>
